<compile_context>
chip_gen: v7x
topology: tpu7x:2x2x1
jax: 0.10.0
libtpu: 0.0.40
codegen_flags: <defaults>
</compile_context>

<pallas_src>
import functools

import jax
import jax.numpy as jnp
from jax.experimental import pallas as pl
from jax.experimental.pallas import tpu as pltpu


def titanic_mlp_kernel(xt_ref, w1_ref, b1_ref, w2_ref, b2_ref, w3_ref, b3_ref,
                       out_ref):
    # All activations are (features, TB): batch lives on the 128-wide lane
    # axis, features on sublanes.
    xt = xt_ref[...]                                         # (12, TB)

    def sigmoid(h):
        # Single EUP op per element (tanh) instead of exp + reciprocal.
        return 0.5 * (jnp.tanh(0.5 * h) + 1.0)

    # linear1 + sigmoid:  W1 (12,12) @ x^T (12,TB) -> (12, TB), f32 accum.
    h1 = jnp.dot(w1_ref[...], xt, preferred_element_type=jnp.float32)
    h1 = sigmoid(h1 + b1_ref[...])

    # linear2 + sigmoid:  W2 (8,12) @ h1 (12,TB) -> (8, TB)
    h2 = jnp.dot(w2_ref[...].astype(h1.dtype), h1,
                 preferred_element_type=jnp.float32)
    h2 = sigmoid(h2 + b2_ref[...])

    # linear3 + 2-class softmax  ==  sigmoid of the logit difference:
    #   d  = (W3[1] - W3[0]) @ h2 + (b3[1] - b3[0])
    #   p1 = sigmoid(d),  p0 = 1 - p1
    w_d = w3_ref[1:2, :] - w3_ref[0:1, :]                    # (1, 8)
    b_d = b3_ref[1:2, 0:1] - b3_ref[0:1, 0:1]                # (1, 1)
    d = jnp.dot(w_d, h2, preferred_element_type=jnp.float32) + b_d  # (1, TB)
    p1 = sigmoid(d)

    # Lane-dense, unmasked full-row stores into the (2, TB) output block.
    out_ref[1:2, :] = p1.astype(out_ref.dtype)
    out_ref[0:1, :] = (1.0 - p1).astype(out_ref.dtype)


def _round_up(n, m):
    return ((n + m - 1) // m) * m


@functools.partial(jax.jit, static_argnames=("block_rows", "use_bf16"))
def titanic_forward(x, params, *, block_rows=None, use_bf16=False):
    """x: (B, 12). params: PyTorch-layout weights/biases. Returns (B, 2)."""
    B, F = x.shape
    assert F == 12

    in_dtype = jnp.bfloat16 if use_bf16 else jnp.float32

    # PyTorch nn.Linear weights (out, in) are used as-is as the MXU LHS.
    w1 = params["w1"].astype(in_dtype)            # (12, 12)
    w2 = params["w2"].astype(in_dtype)            # (8, 12)
    w3 = params["w3"].astype(jnp.float32)         # (2, 8)   (tiny, keep f32)
    b1 = params["b1"].reshape(-1, 1).astype(jnp.float32)   # (12, 1)
    b2 = params["b2"].reshape(-1, 1).astype(jnp.float32)   # (8, 1)
    b3 = params["b3"].reshape(-1, 1).astype(jnp.float32)   # (2, 1)

    # Batch tile: big lane-dense tile (multiple of 128), shrunk so the grid
    # keeps >= 2 steps when the batch allows it (pipelining / megacore).
    if block_rows is None:
        TB = 4096
        while TB > 128 and _round_up(B, 128) < 2 * TB:
            TB //= 2
        TB = max(TB, 128)
    else:
        TB = max(128, _round_up(block_rows, 128))
    Bp = _round_up(B, TB)

    # Batch-on-lanes: (B, 12) -> (12, Bp).  (Ideally the producer would hand
    # us x already feature-major; this one-off transpose stays outside the
    # kernel and the padded columns are computed then dropped.)
    xt = x.T.astype(in_dtype)
    if Bp != B:
        xt = jnp.pad(xt, ((0, 0), (0, Bp - B)))

    grid = (Bp // TB,)

    # Constant-index specs keep the tiny weights/biases VMEM-resident.
    def const_spec(shape):
        return pl.BlockSpec(shape, lambda i: (0, 0))

    in_specs = [
        pl.BlockSpec((12, TB), lambda i: (0, i)),   # x^T: streamed per tile
        const_spec((12, 12)), const_spec((12, 1)),  # w1, b1
        const_spec((8, 12)),  const_spec((8, 1)),   # w2, b2
        const_spec((2, 8)),   const_spec((2, 1)),   # w3, b3
    ]
    out_specs = pl.BlockSpec((2, TB), lambda i: (0, i))

    weight_bytes = (w1.size * w1.dtype.itemsize + w2.size * w2.dtype.itemsize
                    + w3.size * 4 + (12 + 8 + 2) * 4)
    cost = pl.CostEstimate(
        flops=2 * Bp * (12 * 12 + 12 * 8 + 8),      # last layer folded to 1x8
        transcendentals=Bp * (12 + 8 + 1),          # one tanh per sigmoid
        bytes_accessed=Bp * 12 * xt.dtype.itemsize + Bp * 2 * 4 + weight_bytes,
    )

    out_t = pl.pallas_call(
        titanic_mlp_kernel,
        out_shape=jax.ShapeDtypeStruct((2, Bp), jnp.float32),
        grid=grid,
        in_specs=in_specs,
        out_specs=out_specs,
        compiler_params=pltpu.CompilerParams(
            dimension_semantics=(pltpu.PARALLEL,)),
        cost_estimate=cost,
    )(xt, w1, b1, w2, b2, w3, b3)

    return out_t[:, :B].T                            # (B, 2)


def init_params(key):
    """Deterministic synthetic params with nn.Linear-style shapes."""
    ks = jax.random.split(key, 6)

    def uniform(k, shape, fan_in):
        bound = 1.0 / jnp.sqrt(fan_in)
        return jax.random.uniform(k, shape, jnp.float32, -bound, bound)

    return {
        "w1": uniform(ks[0], (12, 12), 12.0),  # linear1.weight (out, in)
        "b1": uniform(ks[1], (12,), 12.0),
        "w2": uniform(ks[2], (8, 12), 12.0),   # linear2.weight
        "b2": uniform(ks[3], (8,), 12.0),
        "w3": uniform(ks[4], (2, 8), 8.0),     # linear3.weight
        "b3": uniform(ks[5], (2,), 8.0),
    }


def reference_forward(x, params):
    h1 = jax.nn.sigmoid(x @ params["w1"].T + params["b1"])
    h2 = jax.nn.sigmoid(h1 @ params["w2"].T + params["b2"])
    logits = h2 @ params["w3"].T + params["b3"]
    return jax.nn.softmax(logits, axis=1)


if __name__ == "__main__":
    key = jax.random.PRNGKey(0)
    k_x, k_x2, k_x3, k_p = jax.random.split(key, 4)
    params = init_params(k_p)

    # Case 1: tiny batch (single 128-lane tile, padded).
    B = 8
    x = jax.random.normal(k_x, (B, 12), dtype=jnp.float32)
    out = jax.block_until_ready(titanic_forward(x, params))
    ref = reference_forward(x, params)
    assert out.shape == (B, 2)
    assert jnp.allclose(out, ref, atol=2e-3, rtol=2e-3)
    assert jnp.allclose(jnp.sum(out, axis=1), jnp.ones((B,)), atol=1e-5)

    # Case 2: multi-step grid with a ragged (padded) last tile.
    B2 = 300
    x2 = jax.random.normal(k_x2, (B2, 12), dtype=jnp.float32)
    out2 = jax.block_until_ready(titanic_forward(x2, params, block_rows=128))
    ref2 = reference_forward(x2, params)
    assert out2.shape == (B2, 2)
    assert jnp.allclose(out2, ref2, atol=2e-3, rtol=2e-3)
    assert jnp.allclose(jnp.sum(out2, axis=1), jnp.ones((B2,)), atol=1e-5)

    # Case 3: bf16-streamed x / large weights (f32 accumulation) -- halves
    # the only real HBM traffic; only the MXU sees bf16, so safe on v5e too.
    B3 = 1024
    x3 = jax.random.normal(k_x3, (B3, 12), dtype=jnp.float32)
    out3 = jax.block_until_ready(titanic_forward(x3, params, use_bf16=True))
    ref3 = reference_forward(x3, params)
    assert out3.shape == (B3, 2)
    assert jnp.allclose(out3, ref3, atol=3e-2, rtol=3e-2)
    assert jnp.allclose(jnp.sum(out3, axis=1), jnp.ones((B3,)), atol=1e-5)

    print("KERNEL_OK")
</pallas_src>

<mosaic_0001>
module attributes {stable_mosaic.version = 11 : i64} {
  func.func @titanic_mlp_kernel(%arg0: i32, %arg1: memref<12x128xf32, #tpu.memory_space<vmem>>, %arg2: memref<12x12xf32, #tpu.memory_space<vmem>>, %arg3: memref<12x1xf32, #tpu.memory_space<vmem>>, %arg4: memref<8x12xf32, #tpu.memory_space<vmem>>, %arg5: memref<8x1xf32, #tpu.memory_space<vmem>>, %arg6: memref<2x8xf32, #tpu.memory_space<vmem>>, %arg7: memref<2x1xf32, #tpu.memory_space<vmem>>, %arg8: memref<2x128xf32, #tpu.memory_space<vmem>>) attributes {dimension_semantics = [#tpu.dimension_semantics<parallel>], iteration_bounds = array<i64: 1>, scalar_prefetch = 0 : i64, scratch_operands = 0 : i64, tpu.core_type = #tpu.core_type<tc>, window_params = [{transform_indices = @transform_0, window_bounds = array<i64: 12, 128>}, {pipeline_mode = #tpu.pipeline_mode<synchronous>, transform_indices = @transform_1, window_bounds = array<i64: 12, 12>}, {pipeline_mode = #tpu.pipeline_mode<synchronous>, transform_indices = @transform_2, window_bounds = array<i64: 12, 1>}, {pipeline_mode = #tpu.pipeline_mode<synchronous>, transform_indices = @transform_3, window_bounds = array<i64: 8, 12>}, {pipeline_mode = #tpu.pipeline_mode<synchronous>, transform_indices = @transform_4, window_bounds = array<i64: 8, 1>}, {pipeline_mode = #tpu.pipeline_mode<synchronous>, transform_indices = @transform_5, window_bounds = array<i64: 2, 8>}, {pipeline_mode = #tpu.pipeline_mode<synchronous>, transform_indices = @transform_6, window_bounds = array<i64: 2, 1>}, {transform_indices = @transform_7, window_bounds = array<i64: 2, 128>}]} {
    %c0 = arith.constant 0 : index
    %c0_0 = arith.constant 0 : index
    %0 = vector.load %arg1[%c0, %c0_0] : memref<12x128xf32, #tpu.memory_space<vmem>>, vector<12x128xf32>
    %c0_1 = arith.constant 0 : index
    %c0_2 = arith.constant 0 : index
    %1 = vector.load %arg2[%c0_1, %c0_2] : memref<12x12xf32, #tpu.memory_space<vmem>>, vector<12x12xf32>
    %cst = arith.constant dense<0.000000e+00> : vector<12x128xf32>
    %2 = tpu.matmul %1, %0, %cst {dimension_numbers = #tpu.dot_dimension_numbers<[1], [0], [0], [1], [0, 0, 1, 1], [], []>} : vector<12x12xf32>, vector<12x128xf32>, vector<12x128xf32> -> vector<12x128xf32>
    %c0_3 = arith.constant 0 : index
    %c0_4 = arith.constant 0 : index
    %3 = vector.load %arg3[%c0_3, %c0_4] : memref<12x1xf32, #tpu.memory_space<vmem>>, vector<12x1xf32>
    %4 = vector.broadcast %3 : vector<12x1xf32> to vector<12x128xf32>
    %5 = arith.addf %2, %4 : vector<12x128xf32>
    %cst_5 = arith.constant 5.000000e-01 : f32
    %6 = vector.broadcast %cst_5 : f32 to vector<12x128xf32>
    %7 = arith.mulf %6, %5 : vector<12x128xf32>
    %8 = math.tanh %7 : vector<12x128xf32>
    %cst_6 = arith.constant 1.000000e+00 : f32
    %9 = vector.broadcast %cst_6 : f32 to vector<12x128xf32>
    %10 = arith.addf %8, %9 : vector<12x128xf32>
    %cst_7 = arith.constant 5.000000e-01 : f32
    %11 = vector.broadcast %cst_7 : f32 to vector<12x128xf32>
    %12 = arith.mulf %11, %10 : vector<12x128xf32>
    %c0_8 = arith.constant 0 : index
    %c0_9 = arith.constant 0 : index
    %13 = vector.load %arg4[%c0_8, %c0_9] : memref<8x12xf32, #tpu.memory_space<vmem>>, vector<8x12xf32>
    %cst_10 = arith.constant dense<0.000000e+00> : vector<8x128xf32>
    %14 = tpu.matmul %13, %12, %cst_10 {dimension_numbers = #tpu.dot_dimension_numbers<[1], [0], [0], [1], [0, 0, 1, 1], [], []>} : vector<8x12xf32>, vector<12x128xf32>, vector<8x128xf32> -> vector<8x128xf32>
    %c0_11 = arith.constant 0 : index
    %c0_12 = arith.constant 0 : index
    %15 = vector.load %arg5[%c0_11, %c0_12] : memref<8x1xf32, #tpu.memory_space<vmem>>, vector<8x1xf32>
    %16 = vector.broadcast %15 : vector<8x1xf32> to vector<8x128xf32>
    %17 = arith.addf %14, %16 : vector<8x128xf32>
    %cst_13 = arith.constant 5.000000e-01 : f32
    %18 = vector.broadcast %cst_13 : f32 to vector<8x128xf32>
    %19 = arith.mulf %18, %17 : vector<8x128xf32>
    %20 = math.tanh %19 : vector<8x128xf32>
    %cst_14 = arith.constant 1.000000e+00 : f32
    %21 = vector.broadcast %cst_14 : f32 to vector<8x128xf32>
    %22 = arith.addf %20, %21 : vector<8x128xf32>
    %cst_15 = arith.constant 5.000000e-01 : f32
    %23 = vector.broadcast %cst_15 : f32 to vector<8x128xf32>
    %24 = arith.mulf %23, %22 : vector<8x128xf32>
    %c1 = arith.constant 1 : index
    %c0_16 = arith.constant 0 : index
    %25 = vector.load %arg6[%c1, %c0_16] : memref<2x8xf32, #tpu.memory_space<vmem>>, vector<1x8xf32>
    %c0_17 = arith.constant 0 : index
    %c0_18 = arith.constant 0 : index
    %26 = vector.load %arg6[%c0_17, %c0_18] : memref<2x8xf32, #tpu.memory_space<vmem>>, vector<1x8xf32>
    %27 = arith.subf %25, %26 : vector<1x8xf32>
    %c1_19 = arith.constant 1 : index
    %c0_20 = arith.constant 0 : index
    %28 = vector.load %arg7[%c1_19, %c0_20] : memref<2x1xf32, #tpu.memory_space<vmem>>, vector<1x1xf32>
    %c0_21 = arith.constant 0 : index
    %c0_22 = arith.constant 0 : index
    %29 = vector.load %arg7[%c0_21, %c0_22] : memref<2x1xf32, #tpu.memory_space<vmem>>, vector<1x1xf32>
    %30 = arith.subf %28, %29 : vector<1x1xf32>
    %cst_23 = arith.constant dense<0.000000e+00> : vector<1x128xf32>
    %31 = tpu.matmul %27, %24, %cst_23 {dimension_numbers = #tpu.dot_dimension_numbers<[1], [0], [0], [1], [0, 0, 1, 1], [], []>} : vector<1x8xf32>, vector<8x128xf32>, vector<1x128xf32> -> vector<1x128xf32>
    %32 = vector.broadcast %30 : vector<1x1xf32> to vector<1x128xf32>
    %33 = arith.addf %31, %32 : vector<1x128xf32>
    %cst_24 = arith.constant 5.000000e-01 : f32
    %34 = vector.broadcast %cst_24 : f32 to vector<1x128xf32>
    %35 = arith.mulf %34, %33 : vector<1x128xf32>
    %36 = math.tanh %35 : vector<1x128xf32>
    %cst_25 = arith.constant 1.000000e+00 : f32
    %37 = vector.broadcast %cst_25 : f32 to vector<1x128xf32>
    %38 = arith.addf %36, %37 : vector<1x128xf32>
    %cst_26 = arith.constant 5.000000e-01 : f32
    %39 = vector.broadcast %cst_26 : f32 to vector<1x128xf32>
    %40 = arith.mulf %39, %38 : vector<1x128xf32>
    %c1_27 = arith.constant 1 : index
    %c0_28 = arith.constant 0 : index
    %41 = vector.load %arg8[%c1_27, %c0_28] : memref<2x128xf32, #tpu.memory_space<vmem>>, vector<1x128xf32>
    tpu.vector_store %arg8[%c1_27, %c0_28], %40 {strides = array<i32>} : memref<2x128xf32, #tpu.memory_space<vmem>>, vector<1x128xf32>,
    %cst_29 = arith.constant 1.000000e+00 : f32
    %42 = vector.broadcast %cst_29 : f32 to vector<1x128xf32>
    %43 = arith.subf %42, %40 : vector<1x128xf32>
    %c0_30 = arith.constant 0 : index
    %c0_31 = arith.constant 0 : index
    %44 = vector.load %arg8[%c0_30, %c0_31] : memref<2x128xf32, #tpu.memory_space<vmem>>, vector<1x128xf32>
    tpu.vector_store %arg8[%c0_30, %c0_31], %43 {strides = array<i32>} : memref<2x128xf32, #tpu.memory_space<vmem>>, vector<1x128xf32>,
    return
  }
  func.func @transform_0(%arg0: i32) -> (i32, i32) {
    %c0_i32 = arith.constant 0 : i32
    %c0_i32_0 = arith.constant 0 : i32
    return %c0_i32, %arg0 : i32, i32
  }
  func.func @transform_1(%arg0: i32) -> (i32, i32) {
    %c0_i32 = arith.constant 0 : i32
    %c0_i32_0 = arith.constant 0 : i32
    %c0_i32_1 = arith.constant 0 : i32
    return %c0_i32, %c0_i32_0 : i32, i32
  }
  func.func @transform_2(%arg0: i32) -> (i32, i32) {
    %c0_i32 = arith.constant 0 : i32
    %c0_i32_0 = arith.constant 0 : i32
    %c0_i32_1 = arith.constant 0 : i32
    return %c0_i32, %c0_i32_0 : i32, i32
  }
  func.func @transform_3(%arg0: i32) -> (i32, i32) {
    %c0_i32 = arith.constant 0 : i32
    %c0_i32_0 = arith.constant 0 : i32
    %c0_i32_1 = arith.constant 0 : i32
    return %c0_i32, %c0_i32_0 : i32, i32
  }
  func.func @transform_4(%arg0: i32) -> (i32, i32) {
    %c0_i32 = arith.constant 0 : i32
    %c0_i32_0 = arith.constant 0 : i32
    %c0_i32_1 = arith.constant 0 : i32
    return %c0_i32, %c0_i32_0 : i32, i32
  }
  func.func @transform_5(%arg0: i32) -> (i32, i32) {
    %c0_i32 = arith.constant 0 : i32
    %c0_i32_0 = arith.constant 0 : i32
    %c0_i32_1 = arith.constant 0 : i32
    return %c0_i32, %c0_i32_0 : i32, i32
  }
  func.func @transform_6(%arg0: i32) -> (i32, i32) {
    %c0_i32 = arith.constant 0 : i32
    %c0_i32_0 = arith.constant 0 : i32
    %c0_i32_1 = arith.constant 0 : i32
    return %c0_i32, %c0_i32_0 : i32, i32
  }
  func.func @transform_7(%arg0: i32) -> (i32, i32) {
    %c0_i32 = arith.constant 0 : i32
    %c0_i32_0 = arith.constant 0 : i32
    return %c0_i32, %arg0 : i32, i32
  }
}

</mosaic_0001>

<bundles_post_ra>
// kernel: titanic_forward.1
= control target key start
LH: loop header
LB: loop body
LE: loop exit
PB: predicated region body
PF: predicated region fallthrough
CT: control target
= control target key end

     0   :  { %vm49_vm0 = vcmask 1043456   ;;  %vm42_vm1 = vcmask 97280   ;;  %vm378_vm2 = vmmov 1   ;;  %v379_v3 = vmov 0   ;;  %s478_s0 = inlined_call_operand.vmem [shape: f32[12,128], index: 0, kind: input, shape index: {}]   ;;  %s479_s1 = inlined_call_operand.vmem [shape: f32[12,12], index: 1, kind: input, shape index: {}]   ;;  %s480_s2 = inlined_call_operand.vmem [shape: f32[12,1], index: 2, kind: input, shape index: {}]   ;;  %s481_s4 = inlined_call_operand.vmem [shape: f32[8,1], index: 4, kind: input, shape index: {}]   ;;  %s482_s6 = inlined_call_operand.vmem [shape: f32[2,1], index: 6, kind: input, shape index: {}]   ;;  %s483_s3 = inlined_call_operand.vmem [shape: f32[8,12], index: 3, kind: input, shape index: {}]   ;;  %s484_s5 = inlined_call_operand.vmem [shape: f32[2,8], index: 5, kind: input, shape index: {}]   ;;  %s485_s7 = inlined_call_operand.vmem [shape: f32[2,128], index: 7, kind: output, shape index: {}]  }
   0x1   :  { %v26_v0 = vld [vmem:[%s478_s0] sm:$0xff]  ;;  %v27_v1 = vld [vmem:[%s478_s0 + $0x8] sm:$0xf]  ;;  %vm429_vm3 = vmpackc.low %vm49_vm0, %vm378_vm2  ;;  %368 = vset.pattern.permute.xlu0 %v379_v3  ;;  %369 = vset.pattern.permute.xlu1 %v379_v3  ;;  %v380_v9 = vmov 0.0|0.0   ;;  %vm381_vm4 = vmmov 0   ;;  %v382_v10 = vmov 0.0  }
   0x2   :  { %v353_v4 = vpack.c.bf16 %v27_v1, %v26_v0  ;;  %v28_v5 = vld [vmem:[%s479_s1] sm:$0xff]  ;;  %v31_v7 = vld [vmem:[%s480_s2 + $0x8] sm:$0xf]  ;;  %359 = vmatprep.subr.bf16.mxu1 %v380_v9  ;;  %345 = vmatprep.mubr.msk.f32.mxu1 %vm381_vm4, %v382_v10  ;;  %vm234_vm5 = vcmask 64512  }
   0x3   :  { %v30_v6 = vld [vmem:[%s480_s2] sm:$0xff]  ;;  %338 = vmatprep.mubr.msk.f32.mxu0 %vm42_vm1, %v28_v5  ;;  %v29_v8 = vld [vmem:[%s479_s1 + $0x8] sm:$0xf] }
   0x4   :  { %34 = vperm.xlu0 %368, %v30_v6   ;;  %355 = vmatprep.subr.msk.bf16.mxu0 %vm429_vm3, %v353_v4  ;;  %v137_v11 = vld [vmem:[%s481_s4] sm:$0xff] }
   0x5   :  { %358 = vmatpush3.bf16.msk.msra.mxu0 %vm429_vm3, %v353_v4  ;;  %v226_v12 = vld [vmem:[%s482_s6 + $0x1] sm:$0x1]  ;;  %v227_v13 = vld [vmem:[%s482_s6] sm:$0x1]  ;;  %140 = vperm.xlu1 %369, %v137_v11  }
   0x6   :  { %348 = vmatprep.subr.mxu0 %v382_v10  ;;  %v228_v14 = vsub.f32 %v226_v12, %v227_v13  ;;  %v136_v30 = vld [vmem:[%s483_s3] sm:$0xff] }
   0x7   :  { %v223_v36 = vld [vmem:[%s484_s5 + $0x1] sm:$0x1]  ;;  %v224_v37 = vld [vmem:[%s484_s5] sm:$0x1] }
   0x8   :  { %39 = vperm.xlu0 %368, %v31_v7   ;;  %339 = vmatmul.mubr.msk.f32.vlgmr.msra.gmra.mrb[0].mxu0 %vm42_vm1, %v29_v8  ;;  %v225_v40 = vsub.f32 %v223_v36, %v224_v37 }
   0x9   :  { %350 = vmatprep.mubr.msk.f32.mxu0 %vm381_vm4, %v382_v10  ;;  %231 = vperm.xlu1 %369, %v228_v14  }
  0x83   :  { %v35_v15 = vpop.permute.xlu0 %34 }
  0x84   :  { %v141_v31 = vpop.permute.xlu1 %140 }
  0x87   :  { %v40_v16 = vpop.permute.xlu0 %39 }
  0x88   :  { %v232_v42 = vpop.permute.xlu1 %231 }
  0xdb   :  { %v340_v17 = vpop.f32.mrb[0].mxu0 }
  0xdc   :  { %v125_v18 = vadd.f32 %v340_v17, %v40_v16  ;;  %v119_v19 = vpop.f32.mrb[1].mxu0 }
  0xdd   :  { %v120_v20 = vadd.f32 %v119_v19, %v35_v15 }
  0xde   :  { %v129_v21 = vmul.f32 0.5, %v125_v18 }
  0xdf   :  { %v128_v22 = vmul.f32 0.5, %v120_v20 }
  0xe0   :  { %370 = vtanh.f32 %v129_v21 }
  0xe1   :  { %372 = vtanh.f32 %v128_v22 }
  0xea   :  { %v371_v23 = vpop.eup %370 }
  0xeb   :  { %v373_v24 = vpop.eup %372  ;;  %v133_v25 = vadd.f32 1.0, %v371_v23 }
  0xec   :  { %v132_v26 = vadd.f32 1.0, %v373_v24 }
  0xed   :  { %v135_v27 = vmul.f32 0.5, %v133_v25 }
  0xee   :  { %v134_v28 = vmul.f32 0.5, %v132_v26 }
  0xf0   :  { %v360_v29 = vpack.c.bf16 %v135_v27, %v134_v28 }
  0xf2   :  { %362 = vmatpush3.bf16.msk.msra.mxu1 %vm429_vm3, %v360_v29 }
  0xf5   :  { %346 = vmatmul.mubr.msk.f32.vlgmr.msra.gmra.mrb[0].mxu1 %vm42_vm1, %v136_v30 }
 0x1c8   :  { %v215_v32 = vpop.f32.mrb[0].mxu1 }
 0x1c9   :  { %v216_v33 = vadd.f32 %v215_v32, %v141_v31  ;;  %v347_v34 = vpop.f32.mrb[1].mxu1 }
 0x1cb   :  { %v219_v35 = vmul.f32 0.5, %v216_v33 }
 0x1cd   :  { %374 = vtanh.f32 %v219_v35 }
 0x1d7   :  { %v375_v38 = vpop.eup %374 }
 0x1d8   :  { %v221_v39 = vadd.f32 1.0, %v375_v38 }
 0x1da   :  { %v222_v41 = vmul.f32 0.5, %v221_v39 }
 0x1dc   :  { %349 = vmatpush3.msra.mxu0 %v222_v41 }
 0x1dd   :  { %351 = vmatmul.mubr.msk.f32.vlgmr.msra.gmra.mrb[2].mxu0 %vm234_vm5, %v225_v40 }
 0x2b0   :  { %v304_v43 = vpop.f32.mrb[2].mxu0 }
 0x2b1   :  { %v305_v44 = vadd.f32 %v304_v43, %v232_v42  ;;  %v352_v45 = vpop.f32.mrb[3].mxu0 }
 0x2b3   :  { %v308_v46 = vmul.f32 0.5, %v305_v44 }
 0x2b5   :  { %376 = vtanh.f32 %v308_v46 }
 0x2bf   :  { %v377_v47 = vpop.eup %376 }
 0x2c0   :  { %v310_v48 = vadd.f32 1.0, %v377_v47 }
 0x2c2   :  { %v311_v49 = vmul.f32 0.5, %v310_v48 }
 0x2c4   :  { %312 = vst [vmem:[%s485_s7 + $0x1] sm:$0x1] %v311_v49  ;;  %v313_v50 = vsub.f32 1.0, %v311_v49 }
 0x2c6   :  { %314 = vst [vmem:[%s485_s7] sm:$0x1] %v313_v50 }

</bundles_post_ra>
